<compile_context>
chip_gen: v7x
topology: tpu7x:2x2x1
jax: 0.10.0
libtpu: 0.0.40
codegen_flags: <defaults>
</compile_context>

<pallas_src>
from typing import NamedTuple

import jax
import jax.numpy as jnp
from jax.experimental import pallas as pl
from jax.experimental.pallas import tpu as pltpu


def _round_up(x, m):
    return (x + m - 1) // m * m


def _pick_tile_h(H_pad, block_h):
    """Largest multiple of 128 that is <= block_h and divides H_pad exactly."""
    best = 128
    t = 128
    cap = min(block_h, H_pad)
    while t <= cap:
        if H_pad % t == 0:
            best = t
        t += 128
    return best


def _vmem_estimate(tm, tH, D_pad, x_bpe, w_bpe, out_bpe, use_scratch):
    """Rough VMEM bytes for the double-buffered tile set (+ f32 accumulator)."""
    est = 2 * (tm * D_pad * x_bpe          # x tile
               + D_pad * 2 * tH * w_bpe    # fused W1 chunk
               + 2 * tH * 4                # fused b1 chunk (f32)
               + tH * D_pad * w_bpe        # W2 chunk
               + D_pad * 4                 # b2 (f32)
               + tm * D_pad * out_bpe)     # output tile
    if use_scratch:
        est += tm * D_pad * 4              # single-buffered f32 accumulator
    return est


def _chip_defaults():
    """(block_m, block_h, physical VMEM bytes) for the local TPU generation."""
    vmem_cap = 128 << 20
    try:
        vmem_cap = int(pltpu.get_tpu_info().vmem_capacity_bytes)
    except Exception:
        pass
    kind = ""
    try:
        kind = jax.devices()[0].device_kind.lower()
    except Exception:
        pass
    if vmem_cap <= (64 << 20) or "v7" in kind:
        # v7x: 64 MiB VMEM/TC, ~3.2 TB/s HBM -> moderate tm, smaller H chunk.
        return 512, 256, min(vmem_cap, 64 << 20)
    if "v6" in kind:
        # v6e: 918 TF/s vs ~1.35 TB/s -> needs large token tiles to be MXU-bound.
        return 1024, 512, vmem_cap
    if "v5" in kind:
        return 512, 512, vmem_cap
    return 512, 512, vmem_cap


class SwiGLUConfig(NamedTuple):
    D: int
    H: int
    D_pad: int
    H_pad: int
    tH: int
    nH: int
    block_m: int
    sub: int
    use_scratch: bool
    vmem_limit_bytes: int


def make_swiglu_config(D, H, x_dtype, w_dtype=None, block_m=None, block_h=None,
                       vmem_limit_bytes=None):
    """Per-generation tiling + VMEM budget for the SwiGLU kernel."""
    x_dtype = jnp.dtype(x_dtype)
    w_dtype = jnp.dtype(w_dtype) if w_dtype is not None else x_dtype
    x_bpe = x_dtype.itemsize
    w_bpe = w_dtype.itemsize
    sub = max(8, 32 // x_bpe)              # sublane multiple: 8 f32, 16 bf16

    def_m, def_h, vmem_cap = _chip_defaults()
    if block_m is None:
        block_m = def_m
    if block_h is None:
        block_h = def_h
    assert block_m % sub == 0, (block_m, sub)
    assert block_h % 128 == 0, block_h

    D_pad = _round_up(D, 128)
    H_pad = _round_up(H, 128)
    tH = _pick_tile_h(H_pad, block_h)      # tight: tH divides H_pad exactly
    nH = H_pad // tH

    # f32 output accumulates directly into the resident output tile.
    use_scratch = x_dtype != jnp.float32
    out_bpe = x_bpe

    budget = vmem_cap - (8 << 20)
    # Shrink the token tile until the tile set fits the physical VMEM budget.
    while (_vmem_estimate(block_m, tH, D_pad, x_bpe, w_bpe, out_bpe, use_scratch)
           > budget and block_m > max(2 * sub, 128)):
        block_m = max(block_m // 2, max(2 * sub, 128))
        block_m = _round_up(block_m, sub)

    if vmem_limit_bytes is None:
        est = _vmem_estimate(block_m, tH, D_pad, x_bpe, w_bpe, out_bpe,
                             use_scratch)
        vmem_limit_bytes = min(max(int(est * 1.25) + (4 << 20), 32 << 20),
                               budget)
    # Never request more than the chip physically has (v7x: 64 MiB).
    vmem_limit_bytes = int(min(vmem_limit_bytes, vmem_cap - (2 << 20)))

    return SwiGLUConfig(D, H, D_pad, H_pad, tH, nH, block_m, sub,
                        use_scratch, vmem_limit_bytes)


def prepare_swiglu_params(w1a, b1a, w1b, b1b, w2, b2, cfg, compute_dtype=None):
    """One-time weight prep: pad, chunk-interleave W1a/W1b, optional cast.

    Call once per parameter set, NOT in the per-forward hot path (it rewrites
    ~3*D*H weight values in HBM).  Weights are stored (in, out) — the
    transpose of nn.Linear's (out, in); biases are (1, out).
    `compute_dtype=jnp.bfloat16` stores the matmul weights in bf16 (MXU peak)
    while keeping biases / accumulation in f32.
    """
    D, H = cfg.D, cfg.H
    D_pad, H_pad, tH, nH = cfg.D_pad, cfg.H_pad, cfg.tH, cfg.nH
    if compute_dtype is not None:
        w1a = w1a.astype(compute_dtype)
        w1b = w1b.astype(compute_dtype)
        w2 = w2.astype(compute_dtype)

    w1a_p = jnp.pad(w1a, ((0, D_pad - D), (0, H_pad - H)))
    w1b_p = jnp.pad(w1b, ((0, D_pad - D), (0, H_pad - H)))
    b1a_p = jnp.pad(b1a.astype(jnp.float32), ((0, 0), (0, H_pad - H)))
    b1b_p = jnp.pad(b1b.astype(jnp.float32), ((0, 0), (0, H_pad - H)))
    w2_p = jnp.pad(w2, ((0, H_pad - H), (0, D_pad - D)))
    b2_p = jnp.pad(b2.astype(jnp.float32), ((0, 0), (0, D_pad - D)))

    # Chunk-wise fuse of the two up-projections: for H-chunk h the fused
    # matrix holds [w1a_chunk | w1b_chunk] contiguously, so each H-chunk needs
    # a single (D, 2*tH) MXU matmul producing [h_a | h_b] side by side.
    w1 = jnp.stack(
        [w1a_p.reshape(D_pad, nH, tH), w1b_p.reshape(D_pad, nH, tH)],
        axis=2).reshape(D_pad, 2 * H_pad)
    b1 = jnp.stack(
        [b1a_p.reshape(1, nH, tH), b1b_p.reshape(1, nH, tH)],
        axis=2).reshape(1, 2 * H_pad)
    return w1, b1, w2_p, b2_p


def _swiglu_kernel_f32_out(x_ref, w1_ref, b1_ref, w2_ref, b2_ref, o_ref):
    """f32 output: accumulate directly into the resident output tile."""
    h = pl.program_id(1)
    tH = w2_ref.shape[0]

    @pl.when(h == 0)
    def _():
        o_ref[...] = jnp.zeros_like(o_ref) + b2_ref[...]      # bias init

    x = x_ref[...].astype(w1_ref.dtype)                       # (tm, D)
    up = jnp.dot(x, w1_ref[...], preferred_element_type=jnp.float32)
    up = up + b1_ref[...]                                      # (tm, 2*tH)
    h_a = up[:, :tH]
    h_b = up[:, tH:]
    gated = (h_a * jax.nn.sigmoid(h_a)) * h_b                  # SiLU gate, f32
    o_ref[...] += jnp.dot(gated.astype(w2_ref.dtype), w2_ref[...],
                          preferred_element_type=jnp.float32)


def _swiglu_kernel_scratch(x_ref, w1_ref, b1_ref, w2_ref, b2_ref, o_ref,
                           acc_ref):
    """Non-f32 output: f32 VMEM accumulator, cast + store on the last chunk."""
    h = pl.program_id(1)
    tH = w2_ref.shape[0]

    @pl.when(h == 0)
    def _():
        acc_ref[...] = jnp.zeros_like(acc_ref) + b2_ref[...]

    x = x_ref[...].astype(w1_ref.dtype)
    up = jnp.dot(x, w1_ref[...], preferred_element_type=jnp.float32)
    up = up + b1_ref[...]
    h_a = up[:, :tH]
    h_b = up[:, tH:]
    gated = (h_a * jax.nn.sigmoid(h_a)) * h_b
    acc_ref[...] += jnp.dot(gated.astype(w2_ref.dtype), w2_ref[...],
                            preferred_element_type=jnp.float32)

    @pl.when(h == pl.num_programs(1) - 1)
    def _():
        o_ref[...] = acc_ref[...].astype(o_ref.dtype)


def mlp_swiglu_prepared(x, w1, b1, w2_p, b2_p, cfg):
    """Hot path: fused SwiGLU MLP forward on pre-padded/fused params.

    x: (N, T, D) -> (N, T, D)
    """
    N, T, D = x.shape
    assert D == cfg.D
    M = N * T

    D_pad, tH, nH = cfg.D_pad, cfg.tH, cfg.nH
    tm = min(cfg.block_m, _round_up(M, cfg.sub))
    M_pad = _round_up(M, tm)

    x2d = x.reshape(M, D)
    if M_pad != M or D_pad != D:
        # Zero padding contributes nothing (silu(0)*0 = 0, 0-rows stay 0+bias
        # but are sliced off below).
        x2d = jnp.pad(x2d, ((0, M_pad - M), (0, D_pad - D)))

    if cfg.use_scratch:
        kernel = _swiglu_kernel_scratch
        scratch = (pltpu.VMEM((tm, D_pad), jnp.float32),)
    else:
        kernel = _swiglu_kernel_f32_out
        scratch = ()

    out2d = pl.pallas_call(
        kernel,
        out_shape=jax.ShapeDtypeStruct((M_pad, D_pad), x.dtype),
        grid_spec=pltpu.PrefetchScalarGridSpec(
            num_scalar_prefetch=0,
            grid=(M_pad // tm, nH),
            in_specs=[
                pl.BlockSpec((tm, D_pad), lambda i, h: (i, 0)),      # x tile
                pl.BlockSpec((D_pad, 2 * tH), lambda i, h: (0, h)),  # W1 fused
                pl.BlockSpec((1, 2 * tH), lambda i, h: (0, h)),      # b1 fused
                pl.BlockSpec((tH, D_pad), lambda i, h: (h, 0)),      # W2 chunk
                pl.BlockSpec((1, D_pad), lambda i, h: (0, 0)),       # b2
            ],
            out_specs=pl.BlockSpec((tm, D_pad), lambda i, h: (i, 0)),
            scratch_shapes=scratch,
        ),
        compiler_params=pltpu.CompilerParams(
            dimension_semantics=("parallel", "arbitrary"),
            vmem_limit_bytes=cfg.vmem_limit_bytes),
    )(x2d, w1, b1, w2_p, b2_p)

    if M_pad != M or D_pad != D:
        out2d = out2d[:M, :D]
    return out2d.reshape(N, T, D)


def mlp_swiglu(x, w1a, b1a, w1b, b1b, w2, b2, *, block_m=None, block_h=None,
               compute_dtype=None, vmem_limit_bytes=None):
    """One-shot convenience wrapper (prep + forward).

    For repeated forwards, call make_swiglu_config / prepare_swiglu_params
    ONCE and reuse mlp_swiglu_prepared — the weight padding / fusion is an
    HBM->HBM rewrite of the full weight set and must not sit on the hot path.
    """
    D = x.shape[-1]
    H = w1a.shape[1]
    cfg = make_swiglu_config(D, H, x.dtype,
                             w_dtype=compute_dtype if compute_dtype is not None
                             else w1a.dtype,
                             block_m=block_m, block_h=block_h,
                             vmem_limit_bytes=vmem_limit_bytes)
    w1, b1, w2_p, b2_p = prepare_swiglu_params(w1a, b1a, w1b, b1b, w2, b2, cfg,
                                               compute_dtype=compute_dtype)
    return mlp_swiglu_prepared(x, w1, b1, w2_p, b2_p, cfg)


def _reference(x, w1a, b1a, w1b, b1b, w2, b2):
    h_a = x @ w1a + b1a
    h_b = x @ w1b + b1b
    gated = jax.nn.silu(h_a) * h_b
    return gated @ w2 + b2


if __name__ == "__main__":
    # Small shapes consistent with the module's forward: x is (N, T, D).
    N, T, D, H = 2, 8, 32, 64
    use_bias = True

    key = jax.random.PRNGKey(0)
    kx, ka, kab, kb, kbb, kc, kcb = jax.random.split(key, 7)

    x = jax.random.normal(kx, (N, T, D), dtype=jnp.float32)

    # Deterministic parameter init (weights stored as (in, out)).
    w1a = jax.random.normal(ka, (D, H), dtype=jnp.float32) * 0.05
    w1b = jax.random.normal(kb, (D, H), dtype=jnp.float32) * 0.05
    w2 = jax.random.normal(kc, (H, D), dtype=jnp.float32) * 0.05
    if use_bias:
        b1a = jax.random.normal(kab, (1, H), dtype=jnp.float32) * 0.01
        b1b = jax.random.normal(kbb, (1, H), dtype=jnp.float32) * 0.01
        b2 = jax.random.normal(kcb, (1, D), dtype=jnp.float32) * 0.01
    else:
        b1a = jnp.zeros((1, H), jnp.float32)
        b1b = jnp.zeros((1, H), jnp.float32)
        b2 = jnp.zeros((1, D), jnp.float32)

    # One-time parameter prep hoisted out of the per-forward hot path.
    cfg = make_swiglu_config(D, H, x.dtype)
    w1, b1, w2_p, b2_p = prepare_swiglu_params(w1a, b1a, w1b, b1b, w2, b2, cfg)

    out = mlp_swiglu_prepared(x, w1, b1, w2_p, b2_p, cfg)
    out = jax.block_until_ready(out)

    ref = _reference(x, w1a, b1a, w1b, b1b, w2, b2)
    assert out.shape == (N, T, D)
    assert jnp.allclose(out, ref, atol=1e-5, rtol=1e-5), (
        float(jnp.max(jnp.abs(out - ref))))

    print("KERNEL_OK")
</pallas_src>

<mosaic_0001>
module attributes {stable_mosaic.version = 11 : i64} {
  func.func @_swiglu_kernel_f32_out(%arg0: i32, %arg1: i32, %arg2: memref<16x128xf32, #tpu.memory_space<vmem>>, %arg3: memref<128x256xf32, #tpu.memory_space<vmem>>, %arg4: memref<1x256xf32, #tpu.memory_space<vmem>>, %arg5: memref<128x128xf32, #tpu.memory_space<vmem>>, %arg6: memref<1x128xf32, #tpu.memory_space<vmem>>, %arg7: memref<16x128xf32, #tpu.memory_space<vmem>>) attributes {dimension_semantics = [#tpu.dimension_semantics<parallel>, #tpu.dimension_semantics<arbitrary>], iteration_bounds = array<i64: 1, 1>, scalar_prefetch = 0 : i64, scratch_operands = 0 : i64, tpu.core_type = #tpu.core_type<tc>, window_params = [{transform_indices = @transform_0, window_bounds = array<i64: 16, 128>}, {transform_indices = @transform_1, window_bounds = array<i64: 128, 256>}, {transform_indices = @transform_2, window_bounds = array<i64: 1, 256>}, {transform_indices = @transform_3, window_bounds = array<i64: 128, 128>}, {pipeline_mode = #tpu.pipeline_mode<synchronous>, transform_indices = @transform_4, window_bounds = array<i64: 1, 128>}, {transform_indices = @transform_5, window_bounds = array<i64: 16, 128>}]} {
    %c0_i32 = arith.constant 0 : i32
    %0 = arith.cmpi eq, %arg1, %c0_i32 : i32
    %1 = arith.extui %0 : i1 to i32
    %c0_i32_0 = arith.constant 0 : i32
    %2 = arith.cmpi ne, %1, %c0_i32_0 : i32
    scf.if %2 {
      %cst_14 = arith.constant 0.000000e+00 : f32
      %23 = vector.broadcast %cst_14 : f32 to vector<16x128xf32>
      %c0_15 = arith.constant 0 : index
      %c0_16 = arith.constant 0 : index
      %24 = vector.load %arg6[%c0_15, %c0_16] : memref<1x128xf32, #tpu.memory_space<vmem>>, vector<1x128xf32>
      %25 = vector.broadcast %24 : vector<1x128xf32> to vector<16x128xf32>
      %26 = arith.addf %23, %25 : vector<16x128xf32>
      %c0_17 = arith.constant 0 : index
      %c0_18 = arith.constant 0 : index
      %27 = vector.load %arg7[%c0_17, %c0_18] : memref<16x128xf32, #tpu.memory_space<vmem>>, vector<16x128xf32>
      tpu.vector_store %arg7[%c0_17, %c0_18], %26 {strides = array<i32>} : memref<16x128xf32, #tpu.memory_space<vmem>>, vector<16x128xf32>,
    } else {
    }
    %c0 = arith.constant 0 : index
    %c0_1 = arith.constant 0 : index
    %3 = vector.load %arg2[%c0, %c0_1] : memref<16x128xf32, #tpu.memory_space<vmem>>, vector<16x128xf32>
    %c0_2 = arith.constant 0 : index
    %c0_3 = arith.constant 0 : index
    %4 = vector.load %arg3[%c0_2, %c0_3] : memref<128x256xf32, #tpu.memory_space<vmem>>, vector<128x256xf32>
    %cst = arith.constant dense<0.000000e+00> : vector<16x256xf32>
    %5 = tpu.matmul %3, %4, %cst {dimension_numbers = #tpu.dot_dimension_numbers<[1], [0], [0], [1], [0, 0, 1, 1], [], []>} : vector<16x128xf32>, vector<128x256xf32>, vector<16x256xf32> -> vector<16x256xf32>
    %c0_4 = arith.constant 0 : index
    %c0_5 = arith.constant 0 : index
    %6 = vector.load %arg4[%c0_4, %c0_5] : memref<1x256xf32, #tpu.memory_space<vmem>>, vector<1x256xf32>
    %7 = vector.broadcast %6 : vector<1x256xf32> to vector<16x256xf32>
    %8 = arith.addf %5, %7 : vector<16x256xf32>
    %9 = vector.extract_strided_slice %8 {offsets = [0, 0], sizes = [16, 128], strides = [1, 1]} : vector<16x256xf32> to vector<16x128xf32>
    %10 = vector.extract_strided_slice %8 {offsets = [0, 128], sizes = [16, 128], strides = [1, 1]} : vector<16x256xf32> to vector<16x128xf32>
    %11 = arith.negf %9 : vector<16x128xf32>
    %12 = math.exp %11 : vector<16x128xf32>
    %cst_6 = arith.constant 1.000000e+00 : f32
    %13 = vector.broadcast %cst_6 : f32 to vector<16x128xf32>
    %14 = arith.addf %13, %12 : vector<16x128xf32>
    %15 = arith.divf %13, %14 : vector<16x128xf32>
    %16 = arith.mulf %9, %15 : vector<16x128xf32>
    %17 = arith.mulf %16, %10 : vector<16x128xf32>
    %c0_7 = arith.constant 0 : index
    %c0_8 = arith.constant 0 : index
    %18 = vector.load %arg7[%c0_7, %c0_8] : memref<16x128xf32, #tpu.memory_space<vmem>>, vector<16x128xf32>
    %c0_9 = arith.constant 0 : index
    %c0_10 = arith.constant 0 : index
    %19 = vector.load %arg5[%c0_9, %c0_10] : memref<128x128xf32, #tpu.memory_space<vmem>>, vector<128x128xf32>
    %cst_11 = arith.constant dense<0.000000e+00> : vector<16x128xf32>
    %20 = tpu.matmul %17, %19, %cst_11 {dimension_numbers = #tpu.dot_dimension_numbers<[1], [0], [0], [1], [0, 0, 1, 1], [], []>} : vector<16x128xf32>, vector<128x128xf32>, vector<16x128xf32> -> vector<16x128xf32>
    %21 = arith.addf %18, %20 : vector<16x128xf32>
    %c0_12 = arith.constant 0 : index
    %c0_13 = arith.constant 0 : index
    %22 = vector.load %arg7[%c0_12, %c0_13] : memref<16x128xf32, #tpu.memory_space<vmem>>, vector<16x128xf32>
    tpu.vector_store %arg7[%c0_12, %c0_13], %21 {strides = array<i32>} : memref<16x128xf32, #tpu.memory_space<vmem>>, vector<16x128xf32>,
    return
  }
  func.func @transform_0(%arg0: i32, %arg1: i32) -> (i32, i32) {
    %c0_i32 = arith.constant 0 : i32
    %c0_i32_0 = arith.constant 0 : i32
    return %arg0, %c0_i32 : i32, i32
  }
  func.func @transform_1(%arg0: i32, %arg1: i32) -> (i32, i32) {
    %c0_i32 = arith.constant 0 : i32
    %c0_i32_0 = arith.constant 0 : i32
    return %c0_i32, %arg1 : i32, i32
  }
  func.func @transform_2(%arg0: i32, %arg1: i32) -> (i32, i32) {
    %c0_i32 = arith.constant 0 : i32
    %c0_i32_0 = arith.constant 0 : i32
    return %c0_i32, %arg1 : i32, i32
  }
  func.func @transform_3(%arg0: i32, %arg1: i32) -> (i32, i32) {
    %c0_i32 = arith.constant 0 : i32
    %c0_i32_0 = arith.constant 0 : i32
    return %arg1, %c0_i32 : i32, i32
  }
  func.func @transform_4(%arg0: i32, %arg1: i32) -> (i32, i32) {
    %c0_i32 = arith.constant 0 : i32
    %c0_i32_0 = arith.constant 0 : i32
    %c0_i32_1 = arith.constant 0 : i32
    return %c0_i32, %c0_i32_0 : i32, i32
  }
  func.func @transform_5(%arg0: i32, %arg1: i32) -> (i32, i32) {
    %c0_i32 = arith.constant 0 : i32
    %c0_i32_0 = arith.constant 0 : i32
    return %arg0, %c0_i32 : i32, i32
  }
}

</mosaic_0001>

<bundles_post_ra>
// kernel: tpu_custom_call.1
= control target key start
LH: loop header
LB: loop body
LE: loop exit
PB: predicated region body
PF: predicated region fallthrough
CT: control target
= control target key end

     0   :  { %10 = vsyncpa [#allocation3], 0  ;;  %s665_s0 = inlined_call_operand.hbm [shape: f32[16,128], index: 0, kind: input, shape index: {}]   ;;  %s666_s1 = inlined_call_operand.hbm [shape: f32[128,256], index: 1, kind: input, shape index: {}]   ;;  %s667_s2 = inlined_call_operand.vmem [shape: f32[1,256], index: 2, kind: input, shape index: {}]   ;;  %s668_s3 = inlined_call_operand.hbm [shape: f32[128,128], index: 3, kind: input, shape index: {}]   ;;  %s669_s4 = inlined_call_operand.vmem [shape: f32[1,128], index: 4, kind: input, shape index: {}]   ;;  %s670_s5 = inlined_call_operand.hbm [shape: f32[16,128], index: 5, kind: output, shape index: {}]  }
   0x1   :  { %11 = vsyncpa [#allocation6], 0 }
   0x2   :  { %12 = vsyncpa [#allocation4], 0  ;;  %s561_s18 = smov [#allocation5]   ;;  %s467_s22 = scalar_lea.hbm %s666_s1, 4096 }
   0x3   :  { %s30_s19 = sshll.u32 %s561_s18, 4  ;;  %p468_p0 = scmp.ne.s32.totalorder %s666_s1, %s467_s22  ;;  %s31_s19 = int_to_ptr.vmem [resolvable:$true] %s30_s19 }
   0x4   :  { %p471_p1 = scmp.lt.u32.totalorder %s467_s22, %s666_s1 }
   0x6   :  { %p473_p2 = pnand %p471_p1, %p468_p0 }
   0x8   :  { %476 = shalt.err (!%p473_p2)
}
   0x9   :  { %s477_s27 = scalar_lea.vmem %s31_s19, 4096  ;;  %p482_p4 = scmp.lt.s32.totalorder %s31_s19, %s31_s19 }
   0xa   :  { %p478_p3 = scmp.ne.s32.totalorder %s31_s19, %s477_s27  ;;  %p483_p5 = scmp.lt.s32.totalorder %s477_s27, %s477_s27 }
   0xc   :  { %p484_p6 = por %p483_p5, %p482_p4 }
   0xe   :  { %p485_p7 = pnand %p484_p6, %p478_p3 }
  0x10   :  { %488 = shalt.err (!%p485_p7)
}
  0x11   :  { %s562_s28 = smov 256   ;;  %s563_s29 = smov 16  }
  0x12   :  { %36 = dma.hbm_to_vmem [thread:$0]  %s666_s1, 4096, %s31_s19, [#allocation6], %s562_s28, %s562_s28, %s563_s29  }
  0x13   :  { %s564_s7 = smov [#allocation2]   ;;  %s489_s11 = scalar_lea.hbm %s665_s0, 256 }
  0x14   :  { %s18_s8 = sshll.u32 %s564_s7, 4  ;;  %p490_p8 = scmp.ne.s32.totalorder %s665_s0, %s489_s11  ;;  %s19_s8 = int_to_ptr.vmem [resolvable:$true] %s18_s8 }
  0x15   :  { %p493_p9 = scmp.lt.u32.totalorder %s489_s11, %s665_s0 }
  0x17   :  { %p495_p10 = pnand %p493_p9, %p490_p8 }
  0x19   :  { %498 = shalt.err (!%p495_p10)
}
  0x1a   :  { %s499_s16 = scalar_lea.vmem %s19_s8, 256  ;;  %p504_p12 = scmp.lt.s32.totalorder %s19_s8, %s19_s8 }
  0x1b   :  { %p500_p11 = scmp.ne.s32.totalorder %s19_s8, %s499_s16  ;;  %p505_p13 = scmp.lt.s32.totalorder %s499_s16, %s499_s16 }
  0x1d   :  { %p506_p0 = por %p505_p13, %p504_p12 }
  0x1f   :  { %p507_p1 = pnand %p506_p0, %p500_p11 }
  0x21   :  { %510 = shalt.err (!%p507_p1)
}
  0x22   :  { %s565_s1 = smov 128   ;;  %s566_s17 = smov 8  }
  0x23   :  { %24 = dma.hbm_to_vmem [thread:$0]  %s665_s0, 256, %s19_s8, [#allocation3], %s565_s1, %s565_s1, %s566_s17  }
  0x24   :  { %s567_s20 = smov [#allocation7]   ;;  %s511_s24 = scalar_lea.hbm %s668_s3, 2048 }
  0x25   :  { %s44_s21 = sshll.u32 %s567_s20, 4  ;;  %p512_p2 = scmp.ne.s32.totalorder %s668_s3, %s511_s24  ;;  %s45_s21 = int_to_ptr.vmem [resolvable:$true] %s44_s21 }
  0x26   :  { %p515_p3 = scmp.lt.u32.totalorder %s511_s24, %s668_s3 }
  0x28   :  { %p517_p4 = pnand %p515_p3, %p512_p2 }
  0x2a   :  { %520 = shalt.err (!%p517_p4)
}
  0x2b   :  { %s521_s29 = scalar_lea.vmem %s45_s21, 2048  ;;  %p526_p6 = scmp.lt.s32.totalorder %s45_s21, %s45_s21 }
  0x2c   :  { %p522_p5 = scmp.ne.s32.totalorder %s45_s21, %s521_s29  ;;  %p527_p7 = scmp.lt.s32.totalorder %s521_s29, %s521_s29 }
  0x2e   :  { %p528_p8 = por %p527_p7, %p526_p6 }
  0x30   :  { %p529_p9 = pnand %p528_p8, %p522_p5 }
  0x32   :  { %532 = shalt.err (!%p529_p9)
}
  0x33   :  { %50 = dma.hbm_to_vmem [thread:$0]  %s668_s3, 2048, %s45_s21, [#allocation6], %s565_s1, %s565_s1, %s566_s17  }
  0x34   :  { %555 = dma.done.wait [#allocation3], 256  }
  0x35   :  { %556 = vsyncadd [#allocation3], 4294967040 }
  0x36   :  { %557 = dma.done.wait [#allocation6], 6144  }
  0x37   :  { %558 = vsyncadd [#allocation6], 4294961152  ;;  %v568_v0 = vmov 0.0   ;;  %v79_v1 = vld [vmem:[#allocation5 + $0x8] sm:$0xff]  ;;  %v81_v2 = vld [vmem:[#allocation5 + $0x18] sm:$0xff]  ;;  %s569_s8 = smov [#allocation8]  }
  0x38   :  { %186 = vmatprep.mubr.f32.mxu0 %v568_v0  ;;  %v78_v3 = vld [vmem:[#allocation5] sm:$0xff]  ;;  %v386_v4 = vpack.c.bf16 %v81_v2, %v79_v1  ;;  %v80_v5 = vld [vmem:[#allocation5 + $0x10] sm:$0xff]  ;;  %v83_v6 = vld [vmem:[#allocation5 + $0x28] sm:$0xff]  ;;  %s317_s9 = sshll.u32 %s569_s8, 4  ;;  %s318_s9 = int_to_ptr.vmem [resolvable:$true] %s317_s9 }
  0x39   :  { %v85_v7 = vld [vmem:[#allocation5 + $0x38] sm:$0xff]  ;;  %v388_v8 = vpack.c.bf16 %v80_v5, %v78_v3  ;;  %v82_v10 = vld [vmem:[#allocation5 + $0x20] sm:$0xff]  ;;  %v84_v11 = vld [vmem:[#allocation5 + $0x30] sm:$0xff]  ;;  %s533_s10 = scalar_lea.vmem %s318_s9, 256  ;;  %p538_p11 = scmp.lt.s32.totalorder %s318_s9, %s318_s9 }
  0x3a   :  { %v390_v9 = vpack.c.bf16 %v85_v7, %v83_v6  ;;  %v87_v12 = vld [vmem:[#allocation5 + $0x48] sm:$0xff]  ;;  %387 = vmatprep.subr.bf16.mxu0 %v386_v4  ;;  %v89_v13 = vld [vmem:[#allocation5 + $0x58] sm:$0xff]  ;;  %v392_v14 = vpack.c.bf16 %v84_v11, %v82_v10  ;;  %v86_v16 = vld [vmem:[#allocation5 + $0x40] sm:$0xff]  ;;  %v112_v11 = vlaneseq  ;;  %p534_p10 = scmp.ne.s32.totalorder %s318_s9, %s533_s10  ;;  %p539_p12 = scmp.lt.s32.totalorder %s533_s10, %s533_s10 }
  0x3b   :  { %389 = vmatpush1.bf16.msra.mxu0 %v388_v8  ;;  %v394_v15 = vpack.c.bf16 %v89_v13, %v87_v12  ;;  %v88_v17 = vld [vmem:[#allocation5 + $0x50] sm:$0xff]  ;;  %v91_v18 = vld [vmem:[#allocation5 + $0x68] sm:$0xff]  ;;  %v93_v19 = vld [vmem:[#allocation5 + $0x78] sm:$0xff] }
  0x3c   :  { %391 = vmatprep.subr.bf16.mxu0 %v390_v9  ;;  %v396_v20 = vpack.c.bf16 %v88_v17, %v86_v16  ;;  %v398_v21 = vpack.c.bf16 %v93_v19, %v91_v18  ;;  %v90_v22 = vld [vmem:[#allocation5 + $0x60] sm:$0xff]  ;;  %v92_v23 = vld [vmem:[#allocation5 + $0x70] sm:$0xff]  ;;  %v95_v24 = vld [vmem:[#allocation5 + $0x88] sm:$0xff]  ;;  %v113_v12 = vshrl.u32 %v112_v11, 7  ;;  %p540_p13 = por %p539_p12, %p538_p11 }
  0x3d   :  { %v97_v25 = vld [vmem:[#allocation5 + $0x98] sm:$0xff]  ;;  %v400_v26 = vpack.c.bf16 %v92_v23, %v90_v22  ;;  %v94_v28 = vld [vmem:[#allocation5 + $0x80] sm:$0xff]  ;;  %v96_v29 = vld [vmem:[#allocation5 + $0x90] sm:$0xff] }
  0x3e   :  { %v402_v27 = vpack.c.bf16 %v97_v25, %v95_v24  ;;  %v99_v30 = vld [vmem:[#allocation5 + $0xa8] sm:$0xff]  ;;  %v101_v31 = vld [vmem:[#allocation5 + $0xb8] sm:$0xff]  ;;  %v404_v32 = vpack.c.bf16 %v96_v29, %v94_v28  ;;  %v98_v34 = vld [vmem:[#allocation5 + $0xa0] sm:$0xff]  ;;  %v114_v13 = vsub.s32 0, %v113_v12  ;;  %v118_v28 = vsub.s32 1, %v113_v12  ;;  %p541_p0 = pnand %p540_p13, %p534_p10 }
  0x3f   :  { %393 = vmatpush1.bf16.msra.mxu0 %v392_v14  ;;  %v406_v33 = vpack.c.bf16 %v101_v31, %v99_v30  ;;  %v100_v35 = vld [vmem:[#allocation5 + $0xb0] sm:$0xff]  ;;  %v103_v36 = vld [vmem:[#allocation5 + $0xc8] sm:$0xff]  ;;  %v105_v37 = vld [vmem:[#allocation5 + $0xd8] sm:$0xff] }
  0x40   :  { %395 = vmatprep.subr.bf16.mxu0 %v394_v15  ;;  %v408_v38 = vpack.c.bf16 %v100_v35, %v98_v34  ;;  %v410_v39 = vpack.c.bf16 %v105_v37, %v103_v36  ;;  %v102_v40 = vld [vmem:[#allocation5 + $0xc0] sm:$0xff]  ;;  %v104_v41 = vld [vmem:[#allocation5 + $0xd0] sm:$0xff]  ;;  %v107_v42 = vld [vmem:[#allocation5 + $0xe8] sm:$0xff] }
  0x41   :  { %v109_v43 = vld [vmem:[#allocation5 + $0xf8] sm:$0xff]  ;;  %v412_v44 = vpack.c.bf16 %v104_v41, %v102_v40  ;;  %v106_v46 = vld [vmem:[#allocation5 + $0xe0] sm:$0xff]  ;;  %v108_v47 = vld [vmem:[#allocation5 + $0xf0] sm:$0xff] }
  0x42   :  { %v414_v45 = vpack.c.bf16 %v109_v43, %v107_v42  ;;  %v416_v48 = vpack.c.bf16 %v108_v47, %v106_v46  ;;  %v76_v49 = vld [vmem:[#allocation2] sm:$0xff]  ;;  %v77_v50 = vld [vmem:[#allocation2 + $0x8] sm:$0xff]  ;;  %v217_v51 = vld [vmem:[#allocation7] sm:$0xff] }
  0x43   :  { %397 = vmatpush1.bf16.msra.mxu0 %v396_v20  ;;  %v218_v52 = vld [vmem:[#allocation7 + $0x8] sm:$0xff]  ;;  %v219_v54 = vld [vmem:[#allocation7 + $0x10] sm:$0xff]  ;;  %v220_v55 = vld [vmem:[#allocation7 + $0x18] sm:$0xff] }
  0x44   :  { %399 = vmatprep.subr.bf16.mxu0 %v398_v21  ;;  %v418_v53 = vpack.c.bf16 %v218_v52, %v217_v51  ;;  %v422_v56 = vpack.c.bf16 %v220_v55, %v219_v54  ;;  %v221_v57 = vld [vmem:[#allocation7 + $0x20] sm:$0xff]  ;;  %v222_v58 = vld [vmem:[#allocation7 + $0x28] sm:$0xff]  ;;  %v223_v60 = vld [vmem:[#allocation7 + $0x30] sm:$0xff] }
  0x45   :  { %v426_v59 = vpack.c.bf16 %v222_v58, %v221_v57  ;;  %v224_v61 = vld [vmem:[#allocation7 + $0x38] sm:$0xff]  ;;  %v225_v63 = vld [vmem:[#allocation7 + $0x40] sm:$0xff]  ;;  %v227_v2 = vld [vmem:[#allocation7 + $0x50] sm:$0xff] }
  0x46   :  { %419 = vmatprep.subr.bf16.mxu1 %v418_v53  ;;  %v430_v62 = vpack.c.bf16 %v224_v61, %v223_v60  ;;  %v228_v3 = vld [vmem:[#allocation7 + $0x58] sm:$0xff]  ;;  %v229_v5 = vld [vmem:[#allocation7 + $0x60] sm:$0xff]  ;;  %v230_v6 = vld [vmem:[#allocation7 + $0x68] sm:$0xff] }
  0x47   :  { %401 = vmatpush1.bf16.msra.mxu0 %v400_v26  ;;  %421 = vmatpush3.bf16.msra.mxu1 %v418_v53  ;;  %v438_v4 = vpack.c.bf16 %v228_v3, %v227_v2  ;;  %v442_v7 = vpack.c.bf16 %v230_v6, %v229_v5  ;;  %v231_v8 = vld [vmem:[#allocation7 + $0x70] sm:$0xff]  ;;  %v232_v9 = vld [vmem:[#allocation7 + $0x78] sm:$0xff] }
  0x48   :  { %403 = vmatprep.subr.bf16.mxu0 %v402_v27  ;;  %423 = vmatprep.subr.bf16.mxu1 %v422_v56  ;;  %v446_v10 = vpack.c.bf16 %v232_v9, %v231_v8  ;;  %v110_v14 = vld [vmem:[%s667_s2] sm:$0x3] }
  0x49   :  { %v115_v15 = vrot.slane %v110_v14, %v114_v13  ;;  %v119_v29 = vrot.slane %v110_v14, %v118_v28 }
  0x4b   :  { %405 = vmatpush1.bf16.msra.mxu0 %v404_v32  ;;  %425 = vmatpush3.bf16.msra.mxu1 %v422_v56 }
  0x4c   :  { %407 = vmatprep.subr.bf16.mxu0 %v406_v33  ;;  %427 = vmatprep.subr.bf16.mxu1 %v426_v59 }
  0x4f   :  { %409 = vmatpush1.bf16.msra.mxu0 %v408_v38  ;;  %429 = vmatpush3.bf16.msra.mxu1 %v426_v59  ;;  %v330_v38 = vld [vmem:[%s669_s4] ss:$0 sm:$0xff] }
  0x50   :  { %411 = vmatprep.subr.bf16.mxu0 %v410_v39  ;;  %431 = vmatprep.subr.bf16.mxu1 %v430_v62 }
  0x53   :  { %413 = vmatpush1.bf16.msra.mxu0 %v412_v44  ;;  %433 = vmatpush3.bf16.msra.mxu1 %v430_v62 }
  0x54   :  { %415 = vmatprep.subr.bf16.mxu0 %v414_v45 }
  0x57   :  { %417 = vmatpush1.bf16.msra.mxu0 %v416_v48 }
  0x5a   :  { %187 = vmatmul.mubr.f32.vlgmr.msra.gmra.mrb[0].mxu0 %v76_v49 }
  0x5b   :  { %192 = vmatprep.mubr.f32.mxu0 %v568_v0  ;;  %v226_v0 = vld [vmem:[#allocation7 + $0x48] sm:$0xff] }
  0x5c   :  { %v434_v1 = vpack.c.bf16 %v226_v0, %v225_v63 }
  0x5e   :  { %193 = vmatmul.mubr.f32.gmra.mrb[2].mxu0 %v77_v50  ;;  %435 = vmatprep.subr.bf16.mxu1 %v434_v1 }
  0x5f   :  { %437 = vmatpush3.bf16.msra.mxu1 %v434_v1 }
  0x60   :  { %439 = vmatprep.subr.bf16.mxu1 %v438_v4 }
  0x63   :  { %441 = vmatpush3.bf16.msra.mxu1 %v438_v4 }
  0x64   :  { %443 = vmatprep.subr.bf16.mxu1 %v442_v7 }
  0x67   :  { %445 = vmatpush3.bf16.msra.mxu1 %v442_v7 }
  0x68   :  { %447 = vmatprep.subr.bf16.mxu1 %v446_v10 }
  0x6b   :  { %449 = vmatpush3.bf16.msra.mxu1 %v446_v10 }
 0x12d   :  { %v188_v16 = vpop.f32.mrb[0].mxu0 }
 0x12e   :  { %v189_v17 = vadd.f32 %v188_v16, %v115_v15  ;;  %v190_v18 = vpop.f32.mrb[1].mxu0 }
 0x12f   :  { %v191_v31 = vadd.f32 %v190_v18, %v119_v29 }
 0x130   :  { %v331_v19 = vmul.f32 -1.442695, %v189_v17 }
 0x131   :  { %v194_v20 = vpop.f32.mrb[2].mxu0 }
 0x132   :  { %459 = vpow2.f32 %v331_v19  ;;  %v195_v21 = vadd.f32 %v194_v20, %v115_v15  ;;  %v196_v22 = vpop.f32.mrb[3].mxu0 }
 0x133   :  { %v197_v36 = vadd.f32 %v196_v22, %v119_v29 }
 0x134   :  { %v332_v23 = vmul.f32 -1.442695, %v195_v21 }
 0x136   :  { %461 = vpow2.f32 %v332_v23 }
 0x13c   :  { %v460_v24 = vpop.eup %459 }
 0x13d   :  { %v205_v25 = vadd.f32 1.0, %v460_v24 }
 0x13f   :  { %463 = vrcp.f32 %v205_v25 }
 0x140   :  { %v462_v26 = vpop.eup %461 }
 0x141   :  { %v206_v27 = vadd.f32 1.0, %v462_v26 }
 0x143   :  { %465 = vrcp.f32 %v206_v27 }
 0x149   :  { %v464_v30 = vpop.eup %463 }
 0x14a   :  { %v211_v32 = vmul.f32 %v464_v30, %v189_v17 }
 0x14c   :  { %v213_v33 = vmul.f32 %v211_v32, %v191_v31 }
 0x14d   :  { %v466_v34 = vpop.eup %465 }
 0x14e   :  { %v212_v35 = vmul.f32 %v466_v34, %v195_v21  ;;  %383 = vmatprep.mubr.f32.mxu1 %v213_v33 }
 0x150   :  { %v214_v37 = vmul.f32 %v212_v35, %v197_v36 }
 0x152   :  { %384 = vmatmul.mubr.f32.vlgmr.msra.gmra.mrb[0].mxu1 %v214_v37 }
 0x225   :  { %v385_v39 = vpop.f32.mrb[0].mxu1 }
 0x226   :  { %v309_v40 = vadd.f32 %v385_v39, %v330_v38  ;;  %v299_v41 = vpop.f32.mrb[1].mxu1 }
 0x227   :  { %v308_v42 = vadd.f32 %v330_v38, %v299_v41 }
 0x228   :  { %311 = vst [vmem:[#allocation8 + $0x8] sm:$0xff] %v309_v40 }
 0x229   :  { %310 = vst [vmem:[#allocation8] sm:$0xff] %v308_v42 }
 0x22a   :  { %544 = shalt.err (!%p541_p0)
}
 0x22b   :  { %s545_s4 = scalar_lea.hbm %s670_s5, 256 }
 0x22c   :  { %p546_p1 = scmp.ne.s32.totalorder %s670_s5, %s545_s4  ;;  %p549_p2 = scmp.lt.u32.totalorder %s545_s4, %s670_s5 }
 0x22e   :  { %p551_p3 = pnand %p549_p2, %p546_p1 }
 0x230   :  { %554 = shalt.err (!%p551_p3)
}
 0x231   :  { %323 = dma.vmem_to_hbm [thread:$0]  %s318_s9, 256, %s670_s5, [#allocation4], %s565_s1, %s565_s1, %s566_s17  }
 0x232   :  { %559 = dma.done.wait [#allocation4], 256  }
 0x233   :  { %560 = vsyncadd [#allocation4], 4294967040 }
 0x234   :  { %327 = vsyncpa [#allocation3], 1 }
 0x235   :  { %328 = vsyncpa [#allocation6], 1 }
 0x236   :  { %329 = vsyncpa [#allocation4], 1 }

</bundles_post_ra>
